<compile_context>
chip_gen: v6e
topology: v6e:2x2x1
jax: 0.10.0
libtpu: 0.0.40
codegen_flags: <defaults>
</compile_context>

<pallas_src>
import jax
import jax.numpy as jnp
from jax.experimental import pallas as pl
from jax.experimental.pallas import tpu as pltpu


# ----------------------------------------------------------------------------
# Kernel 1: blocked full assemble (drop-in replacement for the torch.cat path)
# ----------------------------------------------------------------------------
def _assemble_kernel(prefix_ref, ctx_ref, suffix_ref, out_ref):
    # prefix_ref: (TC, 1, D); ctx_ref: (n_ctx, D); suffix_ref: (TC, n_suf, D)
    # out_ref:    (TC, seq_len, D)
    tc = out_ref.shape[0]
    n_ctx, d = ctx_ref.shape
    # Three direct lane-dense stores; no concat temp, no in-kernel dtype cast.
    out_ref[:, 0:1, :] = prefix_ref[...]
    out_ref[:, 1:1 + n_ctx, :] = jnp.broadcast_to(
        ctx_ref[...][None, :, :], (tc, n_ctx, d))
    out_ref[:, 1 + n_ctx:, :] = suffix_ref[...]


def prompt_learner_forward(ctx, token_prefix, token_suffix, *,
                           classes_per_block=None,
                           block_bytes=8 * 1024 * 1024):
    """ctx: (n_ctx, D); token_prefix: (n_cls, 1, D); token_suffix: (n_cls, n_suf, D)
    -> prompts (n_cls, 1+n_ctx+n_suf, D)."""
    n_ctx, ctx_dim = ctx.shape
    n_cls, one, d_p = token_prefix.shape
    n_suf = token_suffix.shape[1]
    assert one == 1 and d_p == ctx_dim and token_suffix.shape[2] == ctx_dim
    seq_len = 1 + n_ctx + n_suf
    out_dtype = token_prefix.dtype
    itemsize = jnp.dtype(out_dtype).itemsize

    if classes_per_block is None:
        # ~8 MiB output block: near HBM roofline on 128 MiB-VMEM parts, but
        # capped so the grid has >= ~8 steps (keeps both v7x TCs busy and the
        # per-core double-buffered working set under its 32 MiB scoped VMEM).
        classes_per_block = max(1, block_bytes // (seq_len * ctx_dim * itemsize))
        classes_per_block = min(classes_per_block, max(1, pl.cdiv(n_cls, 8)))
    tc = int(min(n_cls, classes_per_block))
    grid = pl.cdiv(n_cls, tc)

    # One-time cast of the tiny (n_ctx, D) ctx instead of per-block in kernel.
    ctx = ctx.astype(out_dtype)

    return pl.pallas_call(
        _assemble_kernel,
        out_shape=jax.ShapeDtypeStruct((n_cls, seq_len, ctx_dim), out_dtype),
        grid_spec=pltpu.PrefetchScalarGridSpec(
            num_scalar_prefetch=0,
            grid=(grid,),
            in_specs=[
                pl.BlockSpec((tc, 1, ctx_dim), lambda i: (i, 0, 0)),      # per-block prefix
                pl.BlockSpec((n_ctx, ctx_dim), lambda i: (0, 0)),          # shared learned ctx
                pl.BlockSpec((tc, n_suf, ctx_dim), lambda i: (i, 0, 0)),   # per-block suffix
            ],
            out_specs=pl.BlockSpec((tc, seq_len, ctx_dim), lambda i: (i, 0, 0)),
        ),
        compiler_params=pltpu.CompilerParams(
            dimension_semantics=("parallel",),           # classes across v7x's 2 TCs
            vmem_limit_bytes=64 * 1024 * 1024,
        ),
    )(token_prefix, ctx, token_suffix)


# ----------------------------------------------------------------------------
# Kernel 2: in-place ctx write into a pre-built frozen prompt buffer
# ----------------------------------------------------------------------------
def build_frozen_prompt_base(token_prefix, token_suffix, n_ctx):
    """Built ONCE at init time (frozen buffers): prefix at row 0, suffix at rows
    1+n_ctx..; zeros where the learned ctx rows will be written each forward."""
    n_cls, _, d = token_prefix.shape
    hole = jnp.zeros((n_cls, n_ctx, d), dtype=token_prefix.dtype)
    return jnp.concatenate([token_prefix, hole, token_suffix], axis=1)


def prompt_learner_forward_inplace(ctx, base_prompts, *, classes_per_block=None,
                                   slab_bytes=4 * 1024 * 1024):
    """Writes only the n_ctx learned rows of every class into `base_prompts`
    (aliased to the output) via chained, double-buffered DMAs.

    For the full ~10x HBM-traffic win, donate `base_prompts` under jit
    (jax.jit(..., donate_argnums=...)); without donation XLA inserts a
    full-buffer copy to satisfy the alias (correct, just slower)."""
    n_ctx, ctx_dim = ctx.shape
    n_cls, seq_len, d = base_prompts.shape
    assert d == ctx_dim and seq_len >= 1 + n_ctx
    itemsize = jnp.dtype(base_prompts.dtype).itemsize

    if classes_per_block is None:
        # ~4 MiB ctx slab: fewer, larger strided DMAs, still small on v7x.
        classes_per_block = max(1, slab_bytes // (n_ctx * ctx_dim * itemsize))
    tc = int(min(n_cls, classes_per_block))
    n_full = n_cls // tc                     # number of full class blocks (>=1)
    rem = n_cls - n_full * tc                # ragged tail, written exactly

    ctx = ctx.astype(base_prompts.dtype)

    def kernel(ctx_ref, base_hbm_ref, out_hbm_ref, ctx_slab, sems):
        del base_hbm_ref  # same HBM buffer as out_hbm_ref (aliased); frozen rows untouched
        # The learned ctx is identical for every class: broadcast ONCE into the
        # VMEM slab and stream that same slab to every class block.
        ctx_slab[...] = jnp.broadcast_to(ctx_ref[...][None, :, :], ctx_slab.shape)

        def start_block(b, slot):
            pltpu.make_async_copy(
                ctx_slab,
                out_hbm_ref.at[pl.ds(b * tc, tc), pl.ds(1, n_ctx), :],
                sems.at[slot],
            ).start()

        def wait_block(slot):
            # Descriptor only supplies the semaphore + copy size (all full
            # blocks are the same size), so a fixed start of 0 is fine.
            pltpu.make_async_copy(
                ctx_slab,
                out_hbm_ref.at[pl.ds(0, tc), pl.ds(1, n_ctx), :],
                sems.at[slot],
            ).wait()

        # Double-buffered DMA chain: at most two writes in flight, never a
        # serialized start();wait() pair.
        start_block(0, 0)

        @pl.loop(1, n_full)
        def _(b):
            slot = b & 1
            start_block(b, slot)        # issue block b
            wait_block(1 - slot)        # retire block b-1

        last_slot = (n_full - 1) & 1
        if rem:
            # Exact-size remainder write: no overlapping re-writes of rows.
            rem_slot = n_full & 1       # that slot's previous DMA already retired
            rem_copy = pltpu.make_async_copy(
                ctx_slab.at[pl.ds(0, rem)],
                out_hbm_ref.at[pl.ds(n_full * tc, rem), pl.ds(1, n_ctx), :],
                sems.at[rem_slot],
            )
            rem_copy.start()
            wait_block(last_slot)
            rem_copy.wait()
        else:
            wait_block(last_slot)

    return pl.pallas_call(
        kernel,
        out_shape=jax.ShapeDtypeStruct((n_cls, seq_len, ctx_dim), base_prompts.dtype),
        grid_spec=pltpu.PrefetchScalarGridSpec(
            num_scalar_prefetch=0,
            grid=(1,),
            in_specs=[
                pl.BlockSpec((n_ctx, ctx_dim), lambda i: (0, 0)),  # ctx -> VMEM
                pl.BlockSpec(memory_space=pl.ANY),                 # frozen prompt buffer (HBM)
            ],
            out_specs=pl.BlockSpec(memory_space=pl.ANY),           # same buffer, written via DMA
            scratch_shapes=[
                pltpu.VMEM((tc, n_ctx, ctx_dim), base_prompts.dtype),
                pltpu.SemaphoreType.DMA((2,)),
            ],
        ),
        input_output_aliases={1: 0},
        compiler_params=pltpu.CompilerParams(
            dimension_semantics=("arbitrary",),
            vmem_limit_bytes=32 * 1024 * 1024,
            has_side_effects=True,   # output produced only via manual DMA
        ),
    )(ctx, base_prompts)


if __name__ == "__main__":
    # Small, module-consistent shapes (CLIP uses seq=77, D=512, n_cls up to 1000s).
    n_cls = 16       # number of classnames
    n_ctx = 8        # number of context tokens
    ctx_dim = 128    # ln_final.weight.shape[0] (lane-dense, multiple of 128)
    seq_len = 24     # total tokenized prompt length
    n_suf = seq_len - 1 - n_ctx
    dtype = jnp.float32  # use bf16 in production to halve HBM bytes

    key = jax.random.PRNGKey(0)
    k_ctx, k_pre, k_suf = jax.random.split(key, 3)

    # nn.init.normal_(ctx_vectors, std=0.02)
    ctx = (0.02 * jax.random.normal(k_ctx, (n_ctx, ctx_dim))).astype(dtype)
    # Frozen token-embedding buffers (synthetic stand-ins for CLIP embeddings).
    token_prefix = jax.random.normal(k_pre, (n_cls, 1, ctx_dim)).astype(dtype)
    token_suffix = jax.random.normal(k_suf, (n_cls, n_suf, ctx_dim)).astype(dtype)

    # Pure-JAX reference: expand ctx over classes and concat along seq axis.
    ctx_expanded = jnp.broadcast_to(ctx[None, :, :], (n_cls, n_ctx, ctx_dim))
    ref = jnp.concatenate([token_prefix, ctx_expanded, token_suffix], axis=-2)

    # --- Kernel 1: blocked full assemble.
    prompts_a = prompt_learner_forward(ctx, token_prefix, token_suffix,
                                       classes_per_block=8)          # even grid
    prompts_a = jax.block_until_ready(prompts_a)
    assert prompts_a.shape == (n_cls, seq_len, ctx_dim), prompts_a.shape
    assert prompts_a.dtype == dtype
    assert jnp.allclose(prompts_a, ref), "assemble kernel mismatch vs reference"

    prompts_a2 = jax.block_until_ready(
        prompt_learner_forward(ctx, token_prefix, token_suffix,
                               classes_per_block=5))                 # ragged last block
    assert jnp.allclose(prompts_a2, ref), "assemble kernel (ragged) mismatch"

    prompts_a3 = jax.block_until_ready(
        prompt_learner_forward(ctx, token_prefix, token_suffix))     # default heuristic
    assert jnp.allclose(prompts_a3, ref), "assemble kernel (default) mismatch"

    # --- Kernel 2: in-place ctx write into the pre-built frozen prompt buffer.
    base = build_frozen_prompt_base(token_prefix, token_suffix, n_ctx)  # once, at init
    prompts_b = jax.block_until_ready(
        prompt_learner_forward_inplace(ctx, base, classes_per_block=8))  # even blocks
    assert prompts_b.shape == (n_cls, seq_len, ctx_dim), prompts_b.shape
    assert jnp.allclose(prompts_b, ref), "in-place kernel mismatch vs reference"

    prompts_b2 = jax.block_until_ready(
        prompt_learner_forward_inplace(ctx, base, classes_per_block=5))  # ragged tail
    assert jnp.allclose(prompts_b2, ref), "in-place kernel (ragged) mismatch"

    # TODO(synk): 'middle'/'front' class_token_position paths need per-class
    # ragged name_len splits (data-dependent seq slicing); only 'end' is
    # kernelized.  batch_size!=None and learned_cls=True variants are likewise
    # left to the caller.
    print("KERNEL_OK")
</pallas_src>

<mosaic_0001>
module attributes {stable_mosaic.version = 11 : i64} {
  func.func @_assemble_kernel(%arg0: i32, %arg1: memref<8x1x128xf32, #tpu.memory_space<vmem>>, %arg2: memref<8x128xf32, #tpu.memory_space<vmem>>, %arg3: memref<8x15x128xf32, #tpu.memory_space<vmem>>, %arg4: memref<8x24x128xf32, #tpu.memory_space<vmem>>) attributes {dimension_semantics = [#tpu.dimension_semantics<parallel>], iteration_bounds = array<i64: 2>, scalar_prefetch = 0 : i64, scratch_operands = 0 : i64, tpu.core_type = #tpu.core_type<tc>, window_params = [{transform_indices = @transform_0, window_bounds = array<i64: 8, 1, 128>}, {pipeline_mode = #tpu.pipeline_mode<synchronous>, transform_indices = @transform_1, window_bounds = array<i64: 8, 128>}, {transform_indices = @transform_2, window_bounds = array<i64: 8, 15, 128>}, {transform_indices = @transform_3, window_bounds = array<i64: 8, 24, 128>}]} {
    %c0 = arith.constant 0 : index
    %c0_0 = arith.constant 0 : index
    %c0_1 = arith.constant 0 : index
    %0 = vector.load %arg1[%c0, %c0_0, %c0_1] : memref<8x1x128xf32, #tpu.memory_space<vmem>>, vector<8x1x128xf32>
    %c0_2 = arith.constant 0 : index
    %c0_3 = arith.constant 0 : index
    %c0_4 = arith.constant 0 : index
    %1 = vector.load %arg4[%c0_2, %c0_3, %c0_4] : memref<8x24x128xf32, #tpu.memory_space<vmem>>, vector<8x1x128xf32>
    tpu.vector_store %arg4[%c0_2, %c0_3, %c0_4], %0 {strides = array<i32>} : memref<8x24x128xf32, #tpu.memory_space<vmem>>, vector<8x1x128xf32>,
    %c0_5 = arith.constant 0 : index
    %c0_6 = arith.constant 0 : index
    %2 = vector.load %arg2[%c0_5, %c0_6] : memref<8x128xf32, #tpu.memory_space<vmem>>, vector<8x128xf32>
    %3 = vector.shape_cast %2 : vector<8x128xf32> to vector<1x8x128xf32>
    %4 = vector.shape_cast %3 : vector<1x8x128xf32> to vector<1x8x128xf32>
    %5 = vector.broadcast %4 : vector<1x8x128xf32> to vector<8x8x128xf32>
    %c0_7 = arith.constant 0 : index
    %c1 = arith.constant 1 : index
    %c0_8 = arith.constant 0 : index
    %6 = vector.load %arg4[%c0_7, %c1, %c0_8] : memref<8x24x128xf32, #tpu.memory_space<vmem>>, vector<8x8x128xf32>
    tpu.vector_store %arg4[%c0_7, %c1, %c0_8], %5 {strides = array<i32>} : memref<8x24x128xf32, #tpu.memory_space<vmem>>, vector<8x8x128xf32>,
    %c0_9 = arith.constant 0 : index
    %c0_10 = arith.constant 0 : index
    %c0_11 = arith.constant 0 : index
    %7 = vector.load %arg3[%c0_9, %c0_10, %c0_11] : memref<8x15x128xf32, #tpu.memory_space<vmem>>, vector<8x15x128xf32>
    %c0_12 = arith.constant 0 : index
    %c9 = arith.constant 9 : index
    %c0_13 = arith.constant 0 : index
    %8 = vector.load %arg4[%c0_12, %c9, %c0_13] : memref<8x24x128xf32, #tpu.memory_space<vmem>>, vector<8x15x128xf32>
    tpu.vector_store %arg4[%c0_12, %c9, %c0_13], %7 {strides = array<i32>} : memref<8x24x128xf32, #tpu.memory_space<vmem>>, vector<8x15x128xf32>,
    return
  }
  func.func @transform_0(%arg0: i32) -> (i32, i32, i32) {
    %c0_i32 = arith.constant 0 : i32
    %c0_i32_0 = arith.constant 0 : i32
    %c0_i32_1 = arith.constant 0 : i32
    return %arg0, %c0_i32, %c0_i32_0 : i32, i32, i32
  }
  func.func @transform_1(%arg0: i32) -> (i32, i32) {
    %c0_i32 = arith.constant 0 : i32
    %c0_i32_0 = arith.constant 0 : i32
    %c0_i32_1 = arith.constant 0 : i32
    return %c0_i32, %c0_i32_0 : i32, i32
  }
  func.func @transform_2(%arg0: i32) -> (i32, i32, i32) {
    %c0_i32 = arith.constant 0 : i32
    %c0_i32_0 = arith.constant 0 : i32
    %c0_i32_1 = arith.constant 0 : i32
    return %arg0, %c0_i32, %c0_i32_0 : i32, i32, i32
  }
  func.func @transform_3(%arg0: i32) -> (i32, i32, i32) {
    %c0_i32 = arith.constant 0 : i32
    %c0_i32_0 = arith.constant 0 : i32
    %c0_i32_1 = arith.constant 0 : i32
    return %arg0, %c0_i32, %c0_i32_0 : i32, i32, i32
  }
}

</mosaic_0001>

<bundles_post_ra>
// kernel: tpu_custom_call.1
= control target key start
LH: loop header
LB: loop body
LE: loop exit
PB: predicated region body
PF: predicated region fallthrough
CT: control target
= control target key end

     0   :  { %8 = vsyncpa [#allocation3], 0  ;;  %s645_s0 = inlined_call_operand.vmem [shape: f32[16,1,128], index: 0, kind: input, shape index: {}]   ;;  %s646_s1 = inlined_call_operand.vmem [shape: f32[8,128], index: 1, kind: input, shape index: {}]   ;;  %s647_s2 = inlined_call_operand.vmem [shape: f32[16,15,128], index: 2, kind: input, shape index: {}]   ;;  %s648_s3 = inlined_call_operand.hbm [shape: f32[16,24,128], index: 3, kind: output, shape index: {}]  }
   0x1   :  { %10 = vsyncpa [#allocation3 + $0x1], 0  ;;  %s479_s12 = smov 0   ;;  %s481_s13 = smov 0  }
   0x2   :  { %s483_s14 = smov 0   ;;  %s485_s15 = smov 0  }
   0x3 LB: > { %s500_s16 = sadd.s32 4294967295, %s454_s15   ;;  %s337_s17 = sadd.s32 4294967294, %s454_s15   ;;  %s454_s15 = sphi %s485_s15, %s654_s15   ;;  %s450_s14 = sphi %s483_s14, %s653_s14   ;;  %s446_s13 = sphi %s481_s13, %s652_s13   ;;  %s442_s12 = sphi %s479_s12, %s651_s12  }
   0x4   : > { %s504_s18 = sadd.s32 1, %s454_s15   ;;  %s96_s19 = sadd.s32 1, %s450_s14 }
   0x5   : > { %s93_s20 = ssub.s32 %s454_s15, %s504_s18  ;;  %p106_p0 = scmp.ne.s32.totalorder %s450_s14, %s446_s13 }
   0x6   : > { %p94_p1 = scmp.eq.s32.totalorder %s93_s20, 0  ;;  %p107_p2 = scmp.eq.s32.totalorder %s500_s16, 1 }
   0x7   : > { %p112_p3 = scmp.ne.s32.totalorder %s446_s13, %s442_s12  ;;  %p113_p4 = scmp.eq.s32.totalorder %s337_s17, 1 }
   0x8   : > { %s515_s21 = scalar_select %p94_p1, %s450_s14, %s96_s19  }
   0x9   : > { %p517_p5 = por %p107_p2, %p106_p0  ;;  %p521_p6 = por %p113_p4, %p112_p3 }
   0xa   : > { %p340_p7 = scmp.ge.s32.totalorder %s454_s15, 1  ;;  %p152_p8 = scmp.lt.s32.totalorder %s454_s15, 3 }
   0xc   : > { %p153_p9 = pnand %p340_p7, %p152_p8 }
   0xd   : > { %s178_s24 = sand.u32 (!%p153_p9), 1, %s446_s13   ;;  %s341_s25 = sshll.u32 (!%p153_p9), %s500_s16, 3 }
   0xe   : > { %156 = sbr.rel (%p153_p9) target bundleno = 55 (0x37), region = 32  ;;  %p182_p10 = scmp.lt.s32.totalorder (!%p153_p9), %s341_s25, 15 }
   0xf   : > { %s351_s26 = smul.u32 (!%p153_p9), 192, %s178_s24 }
  0x10   : > { %s352_s30 = smul.u32 (!%p153_p9), 3072, %s500_s16  ;;  %s605_s16 = scalar_lea.sflag (!%p153_p9), [#allocation3], %s178_s24 }
  0x11   : > { %s534_s29 = scalar_lea.vmem (!%p153_p9), [#allocation2], %s351_s26  ;;  %s456_s26 = smov (!%p153_p9), [#allocation2]  }
  0x12   : > { %s266_s11 = sshll.u32 (!%p153_p9), %s534_s29, 4  ;;  %s584_s20 = scalar_lea.hbm (!%p153_p9), %s648_s3, %s352_s30  ;;  %s592_s11 = int_to_ptr.vmem [resolvable:$true] %s266_s11 }
  0x13   : > { %v210_v0 = vld [vmem:[%s646_s1] sm:$0xff]  ;;  %s656_s25 = smov (!%p182_p10, %s341_s25), 15  ;;  %s398_s27 = sshll.u32 %s456_s26, 4  ;;  %s399_s27 = int_to_ptr.vmem [resolvable:$false] %s398_s27 }
  0x14   : > { %211 = vst [vmem:[%s534_s29 + $0x1] sm:$0xff] %v210_v0  ;;  %212 = vst [vmem:[%s534_s29 + $0x19] sm:$0xff] %v210_v0  ;;  %s184_s6 = scalar_lea.vmem %s645_s0, %s656_s25  ;;  %s350_s7 = sshll.u32 %s656_s25, 4 }
  0x15   : > { %213 = vst [vmem:[%s534_s29 + $0x31] sm:$0xff] %v210_v0  ;;  %214 = vst [vmem:[%s534_s29 + $0x49] sm:$0xff] %v210_v0  ;;  %s551_s10 = scalar_lea.vmem %s647_s2, %s350_s7  ;;  %v194_v1 = vld [vmem:[%s184_s6] sm:$0x1]  ;;  %v195_v2 = vld [vmem:[%s184_s6 + $0x1] sm:$0x1]  ;;  %p401_p0 = scmp.lt.s32.totalorder %s592_s11, %s399_s27 }
  0x16   : > { %215 = vst [vmem:[%s534_s29 + $0x61] sm:$0xff] %v210_v0  ;;  %216 = vst [vmem:[%s534_s29 + $0x79] sm:$0xff] %v210_v0  ;;  %v196_v3 = vld [vmem:[%s184_s6 + $0x2] sm:$0x1]  ;;  %v197_v4 = vld [vmem:[%s184_s6 + $0x3] sm:$0x1] }
  0x17   : > { %217 = vst [vmem:[%s534_s29 + $0x91] sm:$0xff] %v210_v0  ;;  %218 = vst [vmem:[%s534_s29 + $0xa9] sm:$0xff] %v210_v0  ;;  %v198_v5 = vld [vmem:[%s184_s6 + $0x4] sm:$0x1]  ;;  %v199_v6 = vld [vmem:[%s184_s6 + $0x5] sm:$0x1] }
  0x18   : > { %202 = vst [vmem:[%s534_s29] sm:$0x1] %v194_v1  ;;  %203 = vst [vmem:[%s534_s29 + $0x18] sm:$0x1] %v195_v2  ;;  %v200_v7 = vld [vmem:[%s184_s6 + $0x6] sm:$0x1]  ;;  %v221_v11 = vld [vmem:[%s551_s10 + $0x10] sm:$0xff] }
  0x19   : > { %204 = vst [vmem:[%s534_s29 + $0x30] sm:$0x1] %v196_v3  ;;  %205 = vst [vmem:[%s534_s29 + $0x48] sm:$0x1] %v197_v4  ;;  %v201_v8 = vld [vmem:[%s184_s6 + $0x7] sm:$0x1] }
  0x1a   : > { %206 = vst [vmem:[%s534_s29 + $0x60] sm:$0x1] %v198_v5  ;;  %207 = vst [vmem:[%s534_s29 + $0x78] sm:$0x1] %v199_v6  ;;  %v219_v9 = vld [vmem:[%s551_s10] sm:$0xff]  ;;  %v225_v15 = vld [vmem:[%s551_s10 + $0x30] sm:$0xff] }
  0x1b   : > { %208 = vst [vmem:[%s534_s29 + $0x90] sm:$0x1] %v200_v7  ;;  %209 = vst [vmem:[%s534_s29 + $0xa8] sm:$0x1] %v201_v8  ;;  %v220_v10 = vld [vmem:[%s551_s10 + $0x8] sm:$0x7f] }
  0x1c   : > { %235 = vst [vmem:[%s534_s29 + $0x9] sm:$0xff] %v219_v9  ;;  %v222_v12 = vld [vmem:[%s551_s10 + $0x18] sm:$0x7f]  ;;  %236 = vst [vmem:[%s534_s29 + $0x11] sm:$0x7f] %v220_v10  ;;  %v223_v13 = vld [vmem:[%s551_s10 + $0x20] sm:$0xff] }
  0x1d   : > { %237 = vst [vmem:[%s534_s29 + $0x21] sm:$0xff] %v221_v11  ;;  %238 = vst [vmem:[%s534_s29 + $0x29] sm:$0x7f] %v222_v12  ;;  %v224_v14 = vld [vmem:[%s551_s10 + $0x28] sm:$0x7f]  ;;  %v227_v17 = vld [vmem:[%s551_s10 + $0x40] sm:$0xff] }
  0x1e   : > { %239 = vst [vmem:[%s534_s29 + $0x39] sm:$0xff] %v223_v13  ;;  %240 = vst [vmem:[%s534_s29 + $0x41] sm:$0x7f] %v224_v14  ;;  %v226_v16 = vld [vmem:[%s551_s10 + $0x38] sm:$0x7f]  ;;  %v229_v19 = vld [vmem:[%s551_s10 + $0x50] sm:$0xff] }
  0x1f   : > { %241 = vst [vmem:[%s534_s29 + $0x51] sm:$0xff] %v225_v15  ;;  %v228_v18 = vld [vmem:[%s551_s10 + $0x48] sm:$0x7f]  ;;  %242 = vst [vmem:[%s534_s29 + $0x59] sm:$0x7f] %v226_v16  ;;  %v231_v21 = vld [vmem:[%s551_s10 + $0x60] sm:$0xff] }
  0x20   : > { %243 = vst [vmem:[%s534_s29 + $0x69] sm:$0xff] %v227_v17  ;;  %244 = vst [vmem:[%s534_s29 + $0x71] sm:$0x7f] %v228_v18  ;;  %v230_v20 = vld [vmem:[%s551_s10 + $0x58] sm:$0x7f]  ;;  %v233_v23 = vld [vmem:[%s551_s10 + $0x70] sm:$0xff] }
  0x21   : > { %245 = vst [vmem:[%s534_s29 + $0x81] sm:$0xff] %v229_v19  ;;  %246 = vst [vmem:[%s534_s29 + $0x89] sm:$0x7f] %v230_v20  ;;  %v232_v22 = vld [vmem:[%s551_s10 + $0x68] sm:$0x7f]  ;;  %s394_s25 = scalar_lea.vmem %s592_s11, 3072 }
  0x22   : > { %247 = vst [vmem:[%s534_s29 + $0x99] sm:$0xff] %v231_v21  ;;  %v234_v24 = vld [vmem:[%s551_s10 + $0x78] sm:$0x7f]  ;;  %248 = vst [vmem:[%s534_s29 + $0xa1] sm:$0x7f] %v232_v22  ;;  %p395_p11 = scmp.ne.s32.totalorder %s592_s11, %s394_s25  ;;  %s400_s28 = scalar_lea.vmem %s399_s27, 6144 }
  0x23   : > { %249 = vst [vmem:[%s534_s29 + $0xb1] sm:$0xff] %v233_v23  ;;  %250 = vst [vmem:[%s534_s29 + $0xb9] sm:$0x7f] %v234_v24  ;;  %p402_p1 = scmp.lt.s32.totalorder %s400_s28, %s394_s25 }
  0x24   : > { %p396_p12 = pnand %p395_p11, %p517_p5 }
  0x25   : > { %p403_p2 = por %p402_p1, %p401_p0 }
  0x26   : > { %p397_p13 = pneg %p396_p12 }
  0x28   : > { %p404_p3 = pnand %p403_p2, %p397_p13 }
  0x2a   : > { %407 = shalt.err (!%p404_p3)
}
  0x2b   : > { %s408_s24 = scalar_lea.hbm %s584_s20, 3072  ;;  %s412_s4 = scalar_lea.hbm %s648_s3, 6144 }
  0x2c   : > { %p409_p4 = scmp.ne.s32.totalorder %s584_s20, %s408_s24  ;;  %p413_p9 = scmp.lt.s32.totalorder %s584_s20, %s648_s3 }
  0x2d   : > { %p414_p10 = scmp.lt.s32.totalorder %s412_s4, %s408_s24 }
  0x2e   : > { %p410_p7 = pnand %p409_p4, %p517_p5 }
  0x2f   : > { %p415_p11 = por %p414_p10, %p413_p9 }
  0x30   : > { %p411_p8 = pneg %p410_p7 }
  0x32   : > { %p416_p12 = pnand %p415_p11, %p411_p8 }
  0x34   : > { %419 = shalt.err (!%p416_p12)
}
  0x35   : > { %s457_s7 = smov 128   ;;  %s458_s8 = smov 8  }
  0x36   : > { %353 = dma.vmem_to_hbm [thread:$0]  (%p517_p5), %s592_s11, 3072, %s584_s20, %s605_s16, %s457_s7, %s457_s7, %s458_s8  }
  0x37 PF: > { %p359_p13 = scmp.ge.s32.totalorder %s454_s15, 2  ;;  %s281_s9 = sand.u32 1, %s442_s12  }
  0x38   : > { %s282_s10 = scalar_lea.sflag [#allocation3], %s281_s9 }
  0x39   : > { %p356_p0 = pnand %p359_p13, %p521_p6 }
  0x3b   : > { %p357_p1 = pneg %p356_p0 }
  0x3d   : > { %437 = dma.done.wait (%p357_p1), %s282_s10, 3072  }
  0x3e   : > { %439 = vsyncadd (%p357_p1), %s282_s10, 4294964224  ;;  %p13_p2 = scmp.ge.s32.totalorder %s504_s18, 4   ;;  %s651_s12 = smov %s446_s13 }
  0x3f   : > { %s652_s13 = smov %s450_s14  ;;  %s653_s14 = smov %s515_s21 }
  0x40   : > { %s654_s15 = smov %s504_s18  ;;  %15 = sbr.rel (!%p13_p2) target bundleno = 3 (0x3), region = 70 }
  0x45   :  { %287 = vsyncpa [#allocation3], 1 }
  0x46   :  { %289 = vsyncpa [#allocation3 + $0x1], 1 }

</bundles_post_ra>
